<compile_context>
chip_gen: v6e
topology: v6e:2x2x1
jax: 0.10.0
libtpu: 0.0.40
codegen_flags: <defaults>
</compile_context>

<pallas_src>
import functools

import jax
import jax.numpy as jnp
from jax.experimental import pallas as pl
from jax.experimental.pallas import tpu as pltpu


# --------------------------------------------------------------------------- #
# Kernel 1: convolution (single MXU matmul) + per-tile partial BN statistics. #
# --------------------------------------------------------------------------- #
def conv_stats_kernel(x_ref, w_ref, y_ref, stats_ref, *, H, KH, block_n):
    # x_ref    : [block_n, Hp, W*Cin]  bf16  (H-padded, lane-dense folded input)
    # w_ref    : [KH*W*Cin, W*Cout]    bf16  (banded im2col weight; dx + W-pad folded in)
    # y_ref    : [block_n*H, W*Cout]   bf16  (lane-dense conv output slab)
    # stats_ref: [1, 2, W*Cout]        f32   (per-tile [sum, sum-of-squares])
    wcin = x_ref.shape[2]
    rows = block_n * H

    # im2col over dy only: pure sublane slices of the resident block.  The dx
    # offsets and the width zero-padding live inside w_ref, so no lane shifts.
    taps = [x_ref[:, dy:dy + H, :].reshape(rows, wcin) for dy in range(KH)]
    patches = jnp.concatenate(taps, axis=-1)              # [rows, KH*W*Cin] bf16

    y = jnp.dot(patches, w_ref[...],
                preferred_element_type=jnp.float32)       # [rows, W*Cout] f32

    # Store y in bf16 and compute the BN sums from the same bf16-rounded values
    # that pass 2 re-reads (keeps the two passes numerically consistent).
    yb = y.astype(y_ref.dtype)
    y_ref[...] = yb
    yf = yb.astype(jnp.float32)

    s1 = jnp.sum(yf, axis=0, keepdims=True)               # [1, W*Cout]
    s2 = jnp.sum(yf * yf, axis=0, keepdims=True)          # [1, W*Cout]
    stats_ref[...] = jnp.concatenate([s1, s2], axis=0)[None]


# --------------------------------------------------------------------------- #
# Kernel 2: normalize with the global batch stats, affine, ReLU.              #
# --------------------------------------------------------------------------- #
def bn_relu_kernel(y_ref, scale_ref, shift_ref, o_ref):
    # y_ref           : [rows, W*Cout] bf16
    # scale/shift_ref : [1, W*Cout]    f32  (per-channel params pre-tiled over W)
    # o_ref           : [rows, W*Cout] bf16
    y = y_ref[...].astype(jnp.float32)
    z = jnp.maximum(y * scale_ref[...] + shift_ref[...], 0.0)
    o_ref[...] = z.astype(o_ref.dtype)


# --------------------------------------------------------------------------- #
# Wrapper                                                                     #
# --------------------------------------------------------------------------- #
def _pick_block_n(N, per_image_bytes, budget_bytes=8 * 1024 * 1024):
    """Largest divisor of N whose per-tile working set fits the VMEM budget."""
    bn = max(1, min(N, budget_bytes // max(per_image_bytes, 1)))
    while N % bn:
        bn -= 1
    return bn


def _banded_weight(w_oihw, W, padding):
    """[Cout,Cin,KH,KW] -> [KH*W*Cin, W*Cout] with dx taps / W zero-padding folded in.

    Wbig[dy, wi, ci, wo, co] = w[co, ci, dy, dx] with dx = wi - wo + padding
    when 0 <= dx < KW, else 0.  Multiplying the lane-dense input slab
    [rows, W*Cin] by this matrix performs the dx sweep and the width padding
    "for free" inside the single MXU matmul.
    """
    Cout, Cin, KH, KW = w_oihw.shape
    w_f = w_oihw.astype(jnp.float32)
    wb = jnp.zeros((KH, W, Cin, W, Cout), dtype=jnp.float32)
    for wo in range(W):
        for dx in range(KW):
            wi = wo + dx - padding
            if 0 <= wi < W:
                wb = wb.at[:, wi, :, wo, :].set(
                    jnp.transpose(w_f[:, :, :, dx], (2, 1, 0)))   # [KH, Cin, Cout]
    return wb.reshape(KH * W * Cin, W * Cout)


def conv_block_forward(x_nchw, w_oihw, gamma, beta, *, padding=1, eps=1e-5):
    """Pallas implementation of convBlock.forward.  Inputs/outputs are NCHW."""
    N, Cin, H, W = x_nchw.shape
    Cout, Cin_w, KH, KW = w_oihw.shape
    assert Cin == Cin_w
    Hp = H + 2 * padding
    WCin = W * Cin
    WCout = W * Cout

    # Lane-dense folded input: NCHW -> NHWC -> pad H only -> [N, Hp, W*Cin] bf16.
    x_nhwc = jnp.transpose(x_nchw, (0, 2, 3, 1))
    x_hpad = jnp.pad(x_nhwc, ((0, 0), (padding, padding), (0, 0), (0, 0)))
    x_fold = x_hpad.reshape(N, Hp, WCin).astype(jnp.bfloat16)

    # Banded im2col weight (dx offsets and width zero-padding folded in).
    w_big = _banded_weight(w_oihw, W, padding).astype(jnp.bfloat16)

    # Batch tile: largest divisor of N under a conservative VMEM budget
    # (x4 covers double-buffering + in-kernel intermediates).
    per_image = (Hp * WCin * 2          # bf16 input slab
                 + H * KH * WCin * 2    # im2col patches
                 + H * WCout * 2        # bf16 y slab
                 + H * WCout * 4)       # f32 matmul result
    block_n = _pick_block_n(N, 4 * per_image)
    num_tiles = N // block_n
    rows_blk = block_n * H

    cparams = pltpu.CompilerParams(
        dimension_semantics=("parallel",),        # independent tiles -> v7x megacore OK
        vmem_limit_bytes=32 * 1024 * 1024)        # within physical VMEM on v5e/v6e/v7x

    # ---- pass 1: conv + per-tile partial BN sums ----
    kernel1 = functools.partial(conv_stats_kernel, H=H, KH=KH, block_n=block_n)
    y2d, stats = pl.pallas_call(
        kernel1,
        out_shape=(jax.ShapeDtypeStruct((N * H, WCout), jnp.bfloat16),
                   jax.ShapeDtypeStruct((num_tiles, 2, WCout), jnp.float32)),
        grid_spec=pltpu.PrefetchScalarGridSpec(
            num_scalar_prefetch=0,
            grid=(num_tiles,),
            in_specs=[
                pl.BlockSpec((block_n, Hp, WCin), lambda t: (t, 0, 0)),
                pl.BlockSpec((KH * WCin, WCout), lambda t: (0, 0)),
            ],
            out_specs=[
                pl.BlockSpec((rows_blk, WCout), lambda t: (t, 0)),
                pl.BlockSpec((1, 2, WCout), lambda t: (t, 0, 0)),
            ]),
        compiler_params=cparams,
    )(x_fold, w_big)

    # ---- tiny cross-tile combine + per-channel BN params (plain XLA) ----
    count = float(N * H * W)
    s = stats.sum(axis=0).reshape(2, W, Cout).sum(axis=1)        # [2, Cout]
    mean = s[0] / count
    # NOTE: E[x^2] - mean^2 can cancel when |mean| >> std at very large N*H*W;
    # clamped to zero here (a shifted two-pass variance would be safer at scale).
    var = jnp.maximum(s[1] / count - mean * mean, 0.0)
    scale = gamma.astype(jnp.float32) * jax.lax.rsqrt(var + eps)
    shift = beta.astype(jnp.float32) - mean * scale
    scale_row = jnp.tile(scale, W).reshape(1, WCout)             # lane order (w, c)
    shift_row = jnp.tile(shift, W).reshape(1, WCout)

    # ---- pass 2: normalize + affine + ReLU on the stored bf16 y ----
    out2d = pl.pallas_call(
        bn_relu_kernel,
        out_shape=jax.ShapeDtypeStruct((N * H, WCout), jnp.bfloat16),
        grid_spec=pltpu.PrefetchScalarGridSpec(
            num_scalar_prefetch=0,
            grid=(num_tiles,),
            in_specs=[
                pl.BlockSpec((rows_blk, WCout), lambda t: (t, 0)),
                pl.BlockSpec((1, WCout), lambda t: (0, 0)),
                pl.BlockSpec((1, WCout), lambda t: (0, 0)),
            ],
            out_specs=pl.BlockSpec((rows_blk, WCout), lambda t: (t, 0))),
        compiler_params=cparams,
    )(y2d, scale_row, shift_row)

    out = out2d.reshape(N, H, W, Cout)
    return jnp.transpose(out, (0, 3, 1, 2)).astype(x_nchw.dtype)


def _reference(x_nchw, w_oihw, gamma, beta, eps=1e-5):
    """Plain-JAX reference mirroring Conv2d + BN(train) + ReLU.

    Conv inputs are routed through bf16 and the conv result is rounded to bf16
    (like the kernel's MXU path and bf16 y storage) so the comparison is
    apples-to-apples; BN math stays in f32.
    """
    xb = x_nchw.astype(jnp.bfloat16).astype(jnp.float32)
    wb = w_oihw.astype(jnp.bfloat16).astype(jnp.float32)
    y = jax.lax.conv_general_dilated(
        xb, wb, window_strides=(1, 1), padding="SAME",
        dimension_numbers=("NCHW", "OIHW", "NCHW"))
    y = y.astype(jnp.bfloat16).astype(jnp.float32)
    mean = y.mean(axis=(0, 2, 3), keepdims=True)
    var = y.var(axis=(0, 2, 3), keepdims=True)    # biased, as BN normalization uses
    yhat = (y - mean) * jax.lax.rsqrt(var + eps)
    yhat = yhat * gamma[None, :, None, None] + beta[None, :, None, None]
    return jnp.maximum(yhat, 0.0)


if __name__ == "__main__":
    # Small shapes consistent with convBlock(inplace=4, outplace=8, kernel=3, pad=1)
    N, Cin, H, W = 2, 4, 16, 16
    Cout, KH, KW = 8, 3, 3

    key = jax.random.PRNGKey(0)
    kx, kw, kg, kb = jax.random.split(key, 4)
    x = jax.random.normal(kx, (N, Cin, H, W), dtype=jnp.float32)
    w = jax.random.normal(kw, (Cout, Cin, KH, KW), dtype=jnp.float32) * 0.1
    # Exercise the BN affine path with non-trivial learned parameters.
    gamma = 1.0 + 0.1 * jax.random.normal(kg, (Cout,), dtype=jnp.float32)
    beta = 0.1 * jax.random.normal(kb, (Cout,), dtype=jnp.float32)

    fwd = jax.jit(functools.partial(conv_block_forward, padding=1, eps=1e-5))
    out = jax.block_until_ready(fwd(x, w, gamma, beta))
    ref = jax.block_until_ready(_reference(x, w, gamma, beta))

    assert out.shape == (N, Cout, H, W)
    assert jnp.allclose(out, ref, atol=2e-2, rtol=2e-2), "mismatch vs reference"

    print("KERNEL_OK")
</pallas_src>

<mosaic_0001>
module attributes {stable_mosaic.version = 11 : i64} {
  func.func @conv_stats_kernel(%arg0: i32, %arg1: memref<2x18x64xbf16, #tpu.memory_space<vmem>>, %arg2: memref<192x128xbf16, #tpu.memory_space<vmem>>, %arg3: memref<32x128xbf16, #tpu.memory_space<vmem>>, %arg4: memref<1x2x128xf32, #tpu.memory_space<vmem>>) attributes {dimension_semantics = [#tpu.dimension_semantics<parallel>], iteration_bounds = array<i64: 1>, scalar_prefetch = 0 : i64, scratch_operands = 0 : i64, tpu.core_type = #tpu.core_type<tc>, window_params = [{transform_indices = @transform_0, window_bounds = array<i64: 2, 18, 64>}, {pipeline_mode = #tpu.pipeline_mode<synchronous>, transform_indices = @transform_1, window_bounds = array<i64: 192, 128>}, {transform_indices = @transform_2, window_bounds = array<i64: 32, 128>}, {transform_indices = @transform_3, window_bounds = array<i64: 1, 2, 128>}]} {
    %c0 = arith.constant 0 : index
    %c0_0 = arith.constant 0 : index
    %c0_1 = arith.constant 0 : index
    %0 = vector.load %arg1[%c0, %c0_0, %c0_1] : memref<2x18x64xbf16, #tpu.memory_space<vmem>>, vector<2x16x64xbf16>
    %1 = vector.shape_cast %0 : vector<2x16x64xbf16> to vector<32x64xbf16>
    %c0_2 = arith.constant 0 : index
    %c1 = arith.constant 1 : index
    %c0_3 = arith.constant 0 : index
    %2 = vector.load %arg1[%c0_2, %c1, %c0_3] : memref<2x18x64xbf16, #tpu.memory_space<vmem>>, vector<2x16x64xbf16>
    %3 = vector.shape_cast %2 : vector<2x16x64xbf16> to vector<32x64xbf16>
    %c0_4 = arith.constant 0 : index
    %c2 = arith.constant 2 : index
    %c0_5 = arith.constant 0 : index
    %4 = vector.load %arg1[%c0_4, %c2, %c0_5] : memref<2x18x64xbf16, #tpu.memory_space<vmem>>, vector<2x16x64xbf16>
    %5 = vector.shape_cast %4 : vector<2x16x64xbf16> to vector<32x64xbf16>
    %6 = tpu.concatenate %1, %3, %5 in 1 : vector<32x64xbf16>, vector<32x64xbf16>, vector<32x64xbf16> -> vector<32x192xbf16>
    %c0_6 = arith.constant 0 : index
    %c0_7 = arith.constant 0 : index
    %7 = vector.load %arg2[%c0_6, %c0_7] : memref<192x128xbf16, #tpu.memory_space<vmem>>, vector<192x128xbf16>
    %cst = arith.constant dense<0.000000e+00> : vector<32x128xf32>
    %8 = tpu.matmul %6, %7, %cst {dimension_numbers = #tpu.dot_dimension_numbers<[1], [0], [0], [1], [0, 0, 1, 1], [], []>} : vector<32x192xbf16>, vector<192x128xbf16>, vector<32x128xf32> -> vector<32x128xf32>
    %9 = arith.truncf %8 : vector<32x128xf32> to vector<32x128xbf16>
    %c0_8 = arith.constant 0 : index
    %c0_9 = arith.constant 0 : index
    %10 = vector.load %arg3[%c0_8, %c0_9] : memref<32x128xbf16, #tpu.memory_space<vmem>>, vector<32x128xbf16>
    tpu.vector_store %arg3[%c0_8, %c0_9], %9 {strides = array<i32>} : memref<32x128xbf16, #tpu.memory_space<vmem>>, vector<32x128xbf16>,
    %11 = arith.extf %9 : vector<32x128xbf16> to vector<32x128xf32>
    %cst_10 = arith.constant dense<0.000000e+00> : vector<128xf32>
    %12 = vector.multi_reduction <add>, %11, %cst_10 [0] : vector<32x128xf32> to vector<128xf32>
    %13 = vector.shape_cast %12 : vector<128xf32> to vector<1x128xf32>
    %14 = arith.mulf %11, %11 : vector<32x128xf32>
    %cst_11 = arith.constant dense<0.000000e+00> : vector<128xf32>
    %15 = vector.multi_reduction <add>, %14, %cst_11 [0] : vector<32x128xf32> to vector<128xf32>
    %16 = vector.shape_cast %15 : vector<128xf32> to vector<1x128xf32>
    %17 = tpu.concatenate %13, %16 in 0 : vector<1x128xf32>, vector<1x128xf32> -> vector<2x128xf32>
    %18 = vector.shape_cast %17 : vector<2x128xf32> to vector<1x2x128xf32>
    %c0_12 = arith.constant 0 : index
    %c0_13 = arith.constant 0 : index
    %c0_14 = arith.constant 0 : index
    %19 = vector.load %arg4[%c0_12, %c0_13, %c0_14] : memref<1x2x128xf32, #tpu.memory_space<vmem>>, vector<1x2x128xf32>
    tpu.vector_store %arg4[%c0_12, %c0_13, %c0_14], %18 {strides = array<i32>} : memref<1x2x128xf32, #tpu.memory_space<vmem>>, vector<1x2x128xf32>,
    return
  }
  func.func @transform_0(%arg0: i32) -> (i32, i32, i32) {
    %c0_i32 = arith.constant 0 : i32
    %c0_i32_0 = arith.constant 0 : i32
    %c0_i32_1 = arith.constant 0 : i32
    return %arg0, %c0_i32, %c0_i32_0 : i32, i32, i32
  }
  func.func @transform_1(%arg0: i32) -> (i32, i32) {
    %c0_i32 = arith.constant 0 : i32
    %c0_i32_0 = arith.constant 0 : i32
    %c0_i32_1 = arith.constant 0 : i32
    return %c0_i32, %c0_i32_0 : i32, i32
  }
  func.func @transform_2(%arg0: i32) -> (i32, i32) {
    %c0_i32 = arith.constant 0 : i32
    %c0_i32_0 = arith.constant 0 : i32
    return %arg0, %c0_i32 : i32, i32
  }
  func.func @transform_3(%arg0: i32) -> (i32, i32, i32) {
    %c0_i32 = arith.constant 0 : i32
    %c0_i32_0 = arith.constant 0 : i32
    %c0_i32_1 = arith.constant 0 : i32
    return %arg0, %c0_i32, %c0_i32_0 : i32, i32, i32
  }
}

module attributes {stable_mosaic.version = 11 : i64} {
  func.func @bn_relu_kernel(%arg0: i32, %arg1: memref<32x128xbf16, #tpu.memory_space<vmem>>, %arg2: memref<1x128xf32, #tpu.memory_space<vmem>>, %arg3: memref<1x128xf32, #tpu.memory_space<vmem>>, %arg4: memref<32x128xbf16, #tpu.memory_space<vmem>>) attributes {dimension_semantics = [#tpu.dimension_semantics<parallel>], iteration_bounds = array<i64: 1>, scalar_prefetch = 0 : i64, scratch_operands = 0 : i64, tpu.core_type = #tpu.core_type<tc>, window_params = [{transform_indices = @transform_0, window_bounds = array<i64: 32, 128>}, {pipeline_mode = #tpu.pipeline_mode<synchronous>, transform_indices = @transform_1, window_bounds = array<i64: 1, 128>}, {pipeline_mode = #tpu.pipeline_mode<synchronous>, transform_indices = @transform_2, window_bounds = array<i64: 1, 128>}, {transform_indices = @transform_3, window_bounds = array<i64: 32, 128>}]} {
    %c0 = arith.constant 0 : index
    %c0_0 = arith.constant 0 : index
    %0 = vector.load %arg1[%c0, %c0_0] : memref<32x128xbf16, #tpu.memory_space<vmem>>, vector<32x128xbf16>
    %1 = arith.extf %0 : vector<32x128xbf16> to vector<32x128xf32>
    %c0_1 = arith.constant 0 : index
    %c0_2 = arith.constant 0 : index
    %2 = vector.load %arg2[%c0_1, %c0_2] : memref<1x128xf32, #tpu.memory_space<vmem>>, vector<1x128xf32>
    %3 = vector.broadcast %2 : vector<1x128xf32> to vector<32x128xf32>
    %4 = arith.mulf %1, %3 : vector<32x128xf32>
    %c0_3 = arith.constant 0 : index
    %c0_4 = arith.constant 0 : index
    %5 = vector.load %arg3[%c0_3, %c0_4] : memref<1x128xf32, #tpu.memory_space<vmem>>, vector<1x128xf32>
    %6 = vector.broadcast %5 : vector<1x128xf32> to vector<32x128xf32>
    %7 = arith.addf %4, %6 : vector<32x128xf32>
    %cst = arith.constant 0.000000e+00 : f32
    %8 = vector.broadcast %cst : f32 to vector<32x128xf32>
    %9 = arith.maximumf %7, %8 : vector<32x128xf32>
    %10 = arith.truncf %9 : vector<32x128xf32> to vector<32x128xbf16>
    %c0_5 = arith.constant 0 : index
    %c0_6 = arith.constant 0 : index
    %11 = vector.load %arg4[%c0_5, %c0_6] : memref<32x128xbf16, #tpu.memory_space<vmem>>, vector<32x128xbf16>
    tpu.vector_store %arg4[%c0_5, %c0_6], %10 {strides = array<i32>} : memref<32x128xbf16, #tpu.memory_space<vmem>>, vector<32x128xbf16>,
    return
  }
  func.func @transform_0(%arg0: i32) -> (i32, i32) {
    %c0_i32 = arith.constant 0 : i32
    %c0_i32_0 = arith.constant 0 : i32
    return %arg0, %c0_i32 : i32, i32
  }
  func.func @transform_1(%arg0: i32) -> (i32, i32) {
    %c0_i32 = arith.constant 0 : i32
    %c0_i32_0 = arith.constant 0 : i32
    %c0_i32_1 = arith.constant 0 : i32
    return %c0_i32, %c0_i32_0 : i32, i32
  }
  func.func @transform_2(%arg0: i32) -> (i32, i32) {
    %c0_i32 = arith.constant 0 : i32
    %c0_i32_0 = arith.constant 0 : i32
    %c0_i32_1 = arith.constant 0 : i32
    return %c0_i32, %c0_i32_0 : i32, i32
  }
  func.func @transform_3(%arg0: i32) -> (i32, i32) {
    %c0_i32 = arith.constant 0 : i32
    %c0_i32_0 = arith.constant 0 : i32
    return %arg0, %c0_i32 : i32, i32
  }
}

</mosaic_0001>

<bundles_post_ra>
// kernel: tile.13
= control target key start
LH: loop header
LB: loop body
LE: loop exit
PB: predicated region body
PF: predicated region fallthrough
CT: control target
= control target key end

     0   :  { %s28_s0 = inlined_call_operand.vmem [shape: f32[8], index: 0, kind: input, shape index: {}]   ;;  %s29_s1 = inlined_call_operand.vmem [shape: f32[16,8], index: 1, kind: output, shape index: {}]  }
   0x1   :  { %v4_v0 = vld [vmem:[%s28_s0] ss:$0 sm:$0xff] }
   0x2   :  { %5 = vst [vmem:[%s29_s1] sm:$0xff] %v4_v0  ;;  %8 = vst [vmem:[%s29_s1 + $0x8] sm:$0xff] %v4_v0 }

// kernel: tile.14
= control target key start
LH: loop header
LB: loop body
LE: loop exit
PB: predicated region body
PF: predicated region fallthrough
CT: control target
= control target key end

     0   :  { %s133_s10 = smov 120   ;;  %s134_s11 = smov 104   ;;  %vm3_vm0 = vcmask 64512   ;;  %vm9_vm1 = vcmask 1048512   ;;  %vm15_vm2 = vcmask 982912   ;;  %vm21_vm3 = vcmask 917312   ;;  %s209_s0 = inlined_call_operand.vmem [shape: f32[16,8], index: 0, kind: input, shape index: {}]   ;;  %s210_s1 = inlined_call_operand.vmem [shape: f32[1,128], index: 1, kind: output, shape index: {}]  }
   0x1   :  { %v103_v0 = vld [vmem:[%s209_s0 + $0xf] sm:$0x1]   ;;  %v105_v1 = vld [vmem:[%s209_s0 + $0xd] sm:$0x1]   ;;  %v104_v2 = vld [vmem:[%s209_s0 + $0xe] sm:$0x1]  }
   0x2   :  { %7 = vrot.lane.b32.xlu0 %v103_v0, %s133_s10  ;;  %19 = vrot.lane.b32.xlu1 %v105_v1, %s134_s11  ;;  %v106_v3 = vld [vmem:[%s209_s0 + $0xc] sm:$0x1]   ;;  %s135_s16 = smov 112   ;;  %s136_s17 = smov 96   ;;  %v107_v4 = vld [vmem:[%s209_s0 + $0xb] sm:$0x1]  }
   0x3   :  { %v108_v5 = vld [vmem:[%s209_s0 + $0xa] sm:$0x1]   ;;  %v2_v6 = vld [vmem:[%s209_s0] sm:$0x1]   ;;  %s137_s24 = smov 88   ;;  %s138_s25 = smov 80  }
   0x4   :  { %4 = vst.msk [vmem:[#allocation0] sm:$0x1] %vm3_vm0, %v2_v6   ;;  %v109_v7 = vld [vmem:[%s209_s0 + $0x9] sm:$0x1]   ;;  %v110_v8 = vld [vmem:[%s209_s0 + $0x8] sm:$0x1]  }
   0x5   :  { %s139_s30 = smov 72   ;;  %s140_s2 = smov 64   ;;  %v111_v9 = vld [vmem:[%s209_s0 + $0x7] sm:$0x1]   ;;  %v112_v10 = vld [vmem:[%s209_s0 + $0x6] sm:$0x1]  }
   0x6   :  { %13 = vrot.lane.b32.xlu0 %v104_v2, %s135_s16  ;;  %25 = vrot.lane.b32.xlu1 %v106_v3, %s136_s17  ;;  %s141_s7 = smov 56   ;;  %s142_s8 = smov 48   ;;  %v113_v11 = vld [vmem:[%s209_s0 + $0x5] sm:$0x1]   ;;  %v114_v12 = vld [vmem:[%s209_s0 + $0x4] sm:$0x1]  }
   0x7   :  { %s143_s13 = smov 40   ;;  %s144_s14 = smov 32   ;;  %v115_v13 = vld [vmem:[%s209_s0 + $0x3] sm:$0x1]   ;;  %v116_v14 = vld [vmem:[%s209_s0 + $0x2] sm:$0x1]  }
   0x8   :  { %s145_s19 = smov 24   ;;  %s146_s20 = smov 16   ;;  %v117_v15 = vld [vmem:[%s209_s0 + $0x1] sm:$0x1]   ;;  %vm27_vm4 = vcmask 851712   ;;  %vm33_vm5 = vcmask 786112  }
   0x9   :  { %s147_s0 = smov 8   ;;  %vm39_vm6 = vcmask 720512   ;;  %vm45_vm7 = vcmask 654912   ;;  %vm51_vm8 = vcmask 589312   ;;  %vm57_vm9 = vcmask 523712  }
   0xa   :  { %31 = vrot.lane.b32.xlu0 %v107_v4, %s137_s24  ;;  %37 = vrot.lane.b32.xlu1 %v108_v5, %s138_s25  ;;  %vm63_vm10 = vcmask 458112   ;;  %vm69_vm11 = vcmask 392512   ;;  %vm75_vm12 = vcmask 326912   ;;  %vm81_vm13 = vcmask 261312  }
   0xb   :  { %vm87_vm14 = vcmask 195712   ;;  %vm93_vm15 = vcmask 130112  }
   0xe   :  { %43 = vrot.lane.b32.xlu0 %v109_v7, %s139_s30  ;;  %49 = vrot.lane.b32.xlu1 %v110_v8, %s140_s2 }
  0x12   :  { %55 = vrot.lane.b32.xlu0 %v111_v9, %s141_s7  ;;  %61 = vrot.lane.b32.xlu1 %v112_v10, %s142_s8 }
  0x16   :  { %67 = vrot.lane.b32.xlu0 %v113_v11, %s143_s13  ;;  %73 = vrot.lane.b32.xlu1 %v114_v12, %s144_s14 }
  0x1a   :  { %79 = vrot.lane.b32.xlu0 %v115_v13, %s145_s19  ;;  %85 = vrot.lane.b32.xlu1 %v116_v14, %s146_s20 }
  0x1e   :  { %91 = vrot.lane.b32.xlu0 %v117_v15, %s147_s0 }
  0x74   :  { %v8_v16 = vpop.permute.xlu0 %7   ;;  %v20_v17 = vpop.permute.xlu1 %19  }
  0x75   :  { %10 = vst.msk [vmem:[#allocation0] sm:$0x1] %vm9_vm1, %v8_v16  }
  0x78   :  { %v14_v18 = vpop.permute.xlu0 %13   ;;  %v26_v19 = vpop.permute.xlu1 %25  }
  0x79   :  { %16 = vst.msk [vmem:[#allocation0] sm:$0x1] %vm15_vm2, %v14_v18  }
  0x7a   :  { %22 = vst.msk [vmem:[#allocation0] sm:$0x1] %vm21_vm3, %v20_v17  }
  0x7b   :  { %28 = vst.msk [vmem:[#allocation0] sm:$0x1] %vm27_vm4, %v26_v19  }
  0x7c   :  { %v32_v20 = vpop.permute.xlu0 %31   ;;  %v38_v21 = vpop.permute.xlu1 %37  }
  0x7d   :  { %34 = vst.msk [vmem:[#allocation0] sm:$0x1] %vm33_vm5, %v32_v20  }
  0x7e   :  { %40 = vst.msk [vmem:[#allocation0] sm:$0x1] %vm39_vm6, %v38_v21  }
  0x80   :  { %v44_v22 = vpop.permute.xlu0 %43   ;;  %v50_v23 = vpop.permute.xlu1 %49  }
  0x81   :  { %46 = vst.msk [vmem:[#allocation0] sm:$0x1] %vm45_vm7, %v44_v22  }
  0x82   :  { %52 = vst.msk [vmem:[#allocation0] sm:$0x1] %vm51_vm8, %v50_v23  }
  0x84   :  { %v56_v24 = vpop.permute.xlu0 %55   ;;  %v62_v25 = vpop.permute.xlu1 %61  }
  0x85   :  { %58 = vst.msk [vmem:[#allocation0] sm:$0x1] %vm57_vm9, %v56_v24  }
  0x86   :  { %64 = vst.msk [vmem:[#allocation0] sm:$0x1] %vm63_vm10, %v62_v25  }
  0x88   :  { %v68_v26 = vpop.permute.xlu0 %67   ;;  %v74_v27 = vpop.permute.xlu1 %73  }
  0x89   :  { %70 = vst.msk [vmem:[#allocation0] sm:$0x1] %vm69_vm11, %v68_v26  }
  0x8a   :  { %76 = vst.msk [vmem:[#allocation0] sm:$0x1] %vm75_vm12, %v74_v27  }
  0x8c   :  { %v80_v28 = vpop.permute.xlu0 %79   ;;  %v86_v29 = vpop.permute.xlu1 %85  }
  0x8d   :  { %82 = vst.msk [vmem:[#allocation0] sm:$0x1] %vm81_vm13, %v80_v28  }
  0x8e   :  { %88 = vst.msk [vmem:[#allocation0] sm:$0x1] %vm87_vm14, %v86_v29  }
  0x90   :  { %v92_v30 = vpop.permute.xlu0 %91  }
  0x91   :  { %94 = vst.msk [vmem:[#allocation0] sm:$0x1] %vm93_vm15, %v92_v30  }
  0x98   :  { %v99_v31 = vld [vmem:[#allocation0] sm:$0x1] }
  0x99   :  { %102 = vst [vmem:[%s210_s1] sm:$0x1] %v99_v31 }

// kernel: conv_block_forward.3
= control target key start
LH: loop header
LB: loop body
LE: loop exit
PB: predicated region body
PF: predicated region fallthrough
CT: control target
= control target key end

     0   :  { %s140_s0 = inlined_call_operand.vmem [shape: bf16[32,128], index: 0, kind: input, shape index: {}]   ;;  %s141_s1 = inlined_call_operand.vmem [shape: f32[1,128], index: 1, kind: input, shape index: {}]   ;;  %s142_s2 = inlined_call_operand.vmem [shape: f32[1,128], index: 2, kind: input, shape index: {}]   ;;  %s143_s3 = inlined_call_operand.vmem [shape: bf16[32,128], index: 3, kind: output, shape index: {}]  }
   0x1   :  { %v83_v0 = vld [vmem:[%s140_s0] sm:$0xff]   ;;  %v100_v4 = vld [vmem:[%s140_s0 + $0x8] sm:$0xff]  }
   0x2   :  { %v72_v1 = vld [vmem:[%s141_s1] ss:$0 sm:$0xff]  ;;  %v84_v2 = vunpack.c.l.bf16 %v83_v0  ;;  %v85_v3 = vunpack.c.h.bf16 %v83_v0  ;;  %v88_v6 = vunpack.c.l.bf16 %v100_v4  ;;  %v89_v7 = vunpack.c.h.bf16 %v100_v4 }
   0x3   :  { %v73_v5 = vld [vmem:[%s142_s2] ss:$0 sm:$0xff] }
   0x4   :  { %v29_v8 = vmul.f32 %v84_v2, %v72_v1  ;;  %v30_v9 = vmul.f32 %v85_v3, %v72_v1  ;;  %v31_v10 = vmul.f32 %v88_v6, %v72_v1  ;;  %v32_v11 = vmul.f32 %v89_v7, %v72_v1 }
   0x6   :  { %v40_v12 = vadd.f32 %v73_v5, %v29_v8  ;;  %v41_v13 = vadd.f32 %v73_v5, %v30_v9  ;;  %v42_v14 = vadd.f32 %v73_v5, %v31_v10  ;;  %v43_v15 = vadd.f32 %v73_v5, %v32_v11 }
   0x8   :  { %v44_v16 = vmax.f32 %v40_v12, 0.0  ;;  %v45_v17 = vmax.f32 %v41_v13, 0.0  ;;  %v46_v18 = vmax.f32 %v42_v14, 0.0  ;;  %v47_v19 = vmax.f32 %v43_v15, 0.0 }
   0xa   :  { %v93_v20 = vpack.c.bf16 %v45_v17, %v44_v16  ;;  %v98_v21 = vpack.c.bf16 %v47_v19, %v46_v18 }
   0xc   :  { %94 = vst [vmem:[%s143_s3] sm:$0xff] %v93_v20   ;;  %101 = vst [vmem:[%s143_s3 + $0x8] sm:$0xff] %v98_v21  }

// kernel: conv_block_forward.2
= control target key start
LH: loop header
LB: loop body
LE: loop exit
PB: predicated region body
PF: predicated region fallthrough
CT: control target
= control target key end

     0   :  { %vm20_vm0 = vsmask.f32 3328  ;;  %vm21_vm1 = vsmask.f32 7440  ;;  %v418_v3 = vmov 0   ;;  %s419_s30 = smov 64   ;;  %s587_s0 = inlined_call_operand.vmem [shape: bf16[2,18,64], index: 0, kind: input, shape index: {}]   ;;  %s588_s1 = inlined_call_operand.vmem [shape: bf16[192,128], index: 1, kind: input, shape index: {}]   ;;  %s589_s2 = inlined_call_operand.vmem [shape: bf16[32,128], index: 2, kind: output, shape index: {0}]   ;;  %s590_s3 = inlined_call_operand.vmem [shape: f32[1,2,128], index: 3, kind: output, shape index: {1}]  }
   0x1   :  { %v443_v0 = vld [vmem:[%s587_s0] sm:$0xf]  ;;  %v448_v1 = vld [vmem:[%s587_s0 + $0x4] sm:$0xf]  ;;  %v453_v2 = vld [vmem:[%s587_s0 + $0x8] sm:$0x1]  ;;  %231 = vmatprep.subr.bf16.mxu0 %v418_v3  ;;  %378 = vmatprep.subr.bf16.mxu1 %v418_v3 }
   0x2   :  { %v24_v4 = vshrl.u32 %v443_v0, 16  ;;  %v27_v5 = vshll.u32 %v443_v0, 16  ;;  %v33_v6 = vshll.u32 %v448_v1, 16  ;;  %v37_v7 = vshrl.u32 %v448_v1, 16  ;;  %v464_v8 = vld [vmem:[%s587_s0 + $0xc] sm:$0xf]  ;;  %vm489_vm2 = vmor %vm20_vm0, %vm21_vm1 }
   0x3   :  { %v43_v9 = vshll.u32 %v453_v2, 16  ;;  %v470_v10 = vld [vmem:[%s587_s0 + $0x10] sm:$0xf]  ;;  %v475_v11 = vld [vmem:[%s587_s0 + $0x14] sm:$0x1]  ;;  %v48_v12 = vshrl.u32 %v464_v8, 16  ;;  %v339_v13 = vcombine.low %v443_v0, %v448_v1 }
   0x4   :  { %v26_v14 = vrot.slane %v24_v4, 4  ;;  %v29_v15 = vrot.slane %v27_v5, 5  ;;  %v35_v16 = vrot.slane %v33_v6, 5  ;;  %v39_v17 = vrot.slane %v37_v7, 4  ;;  %v404_v26 = vld [vmem:[%s588_s1 + $0x38] sm:$0xff]   ;;  %v405_v34 = vld [vmem:[%s588_s1 + $0x30] sm:$0xff]  }
   0x5   :  { %v45_v18 = vrot.slane %v43_v9, 5  ;;  %v50_v19 = vrot.slane %v48_v12, 4  ;;  %v51_v20 = vshll.u32 %v464_v8, 16  ;;  %v57_v21 = vshll.u32 %v470_v10, 16  ;;  %232 = vmatpush1.bf16.msra.mxu0 %v404_v26  ;;  %390 = vmatpush1.bf16.msra.mxu1 %v404_v26  ;;  %v406_v43 = vld [vmem:[%s588_s1 + $0x28] sm:$0xff]   ;;  %v407_v50 = vld [vmem:[%s588_s1 + $0x20] sm:$0xff]  }
   0x6   :  { %v30_v22 = vor.u32 %v29_v15, %v26_v14  ;;  %v40_v23 = vor.u32 %v39_v17, %v35_v16  ;;  %v61_v24 = vshrl.u32 %v470_v10, 16  ;;  %v67_v25 = vshll.u32 %v475_v11, 16  ;;  %233 = vmatprep.subr.bf16.mxu0 %v418_v3  ;;  %379 = vmatprep.subr.bf16.mxu1 %v418_v3  ;;  %v71_v52 = vld [vmem:[%s587_s0] sm:$0xe]  ;;  %v72_v56 = vld [vmem:[%s587_s0 + $0xc] sm:$0xe] }
   0x7   :  { %v53_v28 = vrot.slane %v51_v20, 5  ;;  %v59_v29 = vrot.slane %v57_v21, 5  ;;  %v340_v30 = vcombine.low %v464_v8, %v470_v10  ;;  %v84_v45 = vrot.slane %v448_v1, 5  ;;  %v408_v58 = vld [vmem:[%s588_s1 + $0x18] sm:$0xff]   ;;  %v409_v4 = vld [vmem:[%s588_s1 + $0x10] sm:$0xff]   ;;  %v410_v5 = vld [vmem:[%s588_s1 + $0x8] sm:$0xff]  }
   0x8   :  { %v31_v31 = vrot.slane %v30_v22, 4  ;;  %v41_v32 = vrot.slane %v40_v23, 4  ;;  %v63_v33 = vrot.slane %v61_v24, 4  ;;  %v69_v39 = vrot.slane %v67_v25, 5  ;;  %v411_v6 = vld [vmem:[%s588_s1] sm:$0xff]   ;;  %v412_v7 = vld [vmem:[%s588_s1 + $0x58] sm:$0xff]  }
   0x9   :  { %v54_v35 = vor.u32 %v53_v28, %v50_v19  ;;  %234 = vmatpush1.bf16.msra.mxu0 %v405_v34  ;;  %391 = vmatpush1.bf16.msra.mxu1 %v405_v34  ;;  %vm79_vm3 = vcmask 1042432   ;;  %vm80_vm4 = vcmask 1046532   ;;  %v86_v48 = vrot.slane %v84_v45, 4  ;;  %v413_v9 = vld [vmem:[%s588_s1 + $0x50] sm:$0xff]   ;;  %v415_v12 = vld [vmem:[%s588_s1 + $0x40] sm:$0xff]  }
   0xa   :  { %v36_v36 = vsel %vm489_vm2, %v31_v31, %v35_v16  ;;  %v46_v37 = vsel %vm489_vm2, %v41_v32, %v45_v18  ;;  %v64_v38 = vor.u32 %v63_v33, %v59_v29  ;;  %235 = vmatprep.subr.bf16.mxu0 %v418_v3  ;;  %380 = vmatprep.subr.bf16.mxu1 %v418_v3  ;;  %v87_v49 = vrot.slane %v453_v2, 5  ;;  %vm81_vm5 = vmor %vm79_vm3, %vm80_vm4 }
   0xb   :  { %v341_v40 = vcombine.low %v36_v36, %v46_v37  ;;  %v55_v41 = vrot.slane %v54_v35, 4  ;;  %v91_v51 = vrot.slane %v470_v10, 5  ;;  %v94_v53 = vrot.slane %v475_v11, 5  ;;  %v414_v11 = vld [vmem:[%s588_s1 + $0x48] sm:$0xff]  }
   0xc   :  { %v65_v42 = vrot.slane %v64_v38, 4  ;;  %v337_v54 = vrot.slane %v71_v52, 9  ;;  %v88_v55 = vsel %vm81_vm5, %v86_v48, %v87_v49  ;;  %v338_v59 = vrot.slane %v72_v56, 9 }
   0xd   :  { %110 = vrot.lane.b32.xlu0 %v341_v40, %s419_s30  ;;  %v60_v44 = vsel %vm489_vm2, %v55_v41, %v59_v29  ;;  %236 = vmatpush1.bf16.msra.mxu0 %v406_v43  ;;  %v93_v57 = vrot.slane %v91_v51, 4  ;;  %vm120_vm6 = vcmask 523264   ;;  %vm326_vm7 = vcmask 1040384  }
   0xe   :  { %v70_v46 = vsel %vm489_vm2, %v65_v42, %v69_v39  ;;  %392 = vmatpush1.bf16.msra.mxu1 %v406_v43  ;;  %237 = vmatprep.subr.bf16.mxu0 %v418_v3  ;;  %v85_v60 = vsel %vm81_vm5, %v337_v54, %v84_v45  ;;  %v92_v63 = vsel %vm81_vm5, %v338_v59, %v91_v51 }
   0xf   :  { %v342_v47 = vcombine.low %v60_v44, %v70_v46  ;;  %381 = vmatprep.subr.bf16.mxu1 %v418_v3  ;;  %v95_v61 = vsel %vm81_vm5, %v93_v57, %v94_v53  ;;  %v343_v62 = vcombine.low %v85_v60, %v88_v55 }
  0x10   :  { %v344_v2 = vcombine.low %v92_v63, %v95_v61 }
  0x11   :  { %112 = vrot.lane.b32.xlu0 %v342_v47, %s419_s30  ;;  %238 = vmatpush1.bf16.msra.mxu0 %v407_v50 }
  0x12   :  { %393 = vmatpush1.bf16.msra.mxu1 %v407_v50  ;;  %239 = vmatprep.subr.bf16.mxu0 %v418_v3 }
  0x13   :  { %382 = vmatprep.subr.bf16.mxu1 %v418_v3  ;;  %357 = vmatprep.mubr.msk.bf16.mxu0 %vm120_vm6, %v343_v62 }
  0x14   :  { %358 = vmatprep.mubr.msk.bf16.mxu1 %vm120_vm6, %v344_v2 }
  0x15   :  { %240 = vmatpush1.bf16.msra.mxu0 %v408_v58 }
  0x16   :  { %394 = vmatpush1.bf16.msra.mxu1 %v408_v58  ;;  %241 = vmatprep.subr.bf16.mxu0 %v418_v3 }
  0x17   :  { %383 = vmatprep.subr.bf16.mxu1 %v418_v3 }
  0x19   :  { %242 = vmatpush1.bf16.msra.mxu0 %v409_v4 }
  0x1a   :  { %395 = vmatpush1.bf16.msra.mxu1 %v409_v4  ;;  %243 = vmatprep.subr.bf16.mxu0 %v418_v3 }
  0x1b   :  { %384 = vmatprep.subr.bf16.mxu1 %v418_v3 }
  0x1d   :  { %244 = vmatpush1.bf16.msra.mxu0 %v410_v5 }
  0x1e   :  { %396 = vmatpush1.bf16.msra.mxu1 %v410_v5  ;;  %245 = vmatprep.subr.bf16.mxu0 %v418_v3 }
  0x1f   :  { %385 = vmatprep.subr.bf16.mxu1 %v418_v3 }
  0x21   :  { %246 = vmatpush1.bf16.msra.mxu0 %v411_v6 }
  0x22   :  { %397 = vmatpush1.bf16.msra.mxu1 %v411_v6  ;;  %255 = vmatprep.subr.bf16.mxu0 %v418_v3 }
  0x23   :  { %386 = vmatprep.subr.bf16.mxu1 %v418_v3 }
  0x25   :  { %256 = vmatpush2.bf16.msra.mxu0 %v412_v7 }
  0x26   :  { %398 = vmatpush2.bf16.msra.mxu1 %v412_v7  ;;  %257 = vmatprep.subr.bf16.mxu0 %v418_v3 }
  0x27   :  { %387 = vmatprep.subr.bf16.mxu1 %v418_v3 }
  0x29   :  { %258 = vmatpush2.bf16.msra.mxu0 %v413_v9 }
  0x2a   :  { %399 = vmatpush2.bf16.msra.mxu1 %v413_v9  ;;  %259 = vmatprep.subr.bf16.mxu0 %v418_v3 }
  0x2b   :  { %388 = vmatprep.subr.bf16.mxu1 %v418_v3 }
  0x2d   :  { %260 = vmatpush2.bf16.msra.mxu0 %v414_v11 }
  0x2e   :  { %400 = vmatpush2.bf16.msra.mxu1 %v414_v11  ;;  %261 = vmatprep.subr.bf16.mxu0 %v418_v3 }
  0x2f   :  { %389 = vmatprep.subr.bf16.mxu1 %v418_v3 }
  0x31   :  { %262 = vmatpush2.bf16.msra.mxu0 %v415_v12 }
  0x32   :  { %401 = vmatpush2.bf16.msra.mxu1 %v415_v12 }
  0x7f   :  { %v111_v14 = vpop.permute.xlu0 %110 }
  0x80   :  { %v123_v15 = vsel %vm120_vm6, %v339_v13, %v111_v14 }
  0x81   :  { %264 = vmatmul.mubr.bf16.vlgmr.msra.gmra.mxu0 %v123_v15 }
  0x83   :  { %v113_v16 = vpop.permute.xlu0 %112 }
  0x84   :  { %v127_v17 = vsel %vm120_vm6, %v340_v30, %v113_v16 }
  0x85   :  { %272 = vmatmul.mubr.bf16.vlgmr.msra.gmra.mxu1 %v127_v17 }
 0x141   :  { %v265_v18 = vpop.f32.mrf.mxu0 }
 0x143   :  { %v267_v19 = vpop.f32.mrf.mxu0 }
 0x145   :  { %v268_v20 = vpop.f32.mrf.mxu0  ;;  %v273_v3 = vpop.f32.mrf.mxu1 }
 0x146   :  { %v280_v21 = vpack.c.bf16 %v268_v20, %v265_v18 }
 0x147   :  { %v270_v22 = vpop.f32.mrf.mxu0  ;;  %v275_v23 = vpop.f32.mrf.mxu1 }
 0x148   :  { %371 = vst [vmem:[%s589_s2] sm:$0xff] %v280_v21   ;;  %v300_v0 = vunpack.c.l.bf16 %v280_v21  ;;  %v301_v1 = vunpack.c.h.bf16 %v280_v21 }
 0x149   :  { %v276_v13 = vpop.f32.mrf.mxu1 }
 0x14a   :  { %v313_v24 = vmul.f32 %v300_v0, %v300_v0  ;;  %v314_v25 = vmul.f32 %v301_v1, %v301_v1  ;;  %v281_v8 = vpack.c.bf16 %v276_v13, %v273_v3  ;;  %v304_v26 = vadd.f32 %v301_v1, %v300_v0 }
 0x14b   :  { %v278_v10 = vpop.f32.mrf.mxu1 }
 0x14c   :  { %377 = vst [vmem:[%s589_s2 + $0x8] sm:$0xff] %v281_v8   ;;  %v302_v27 = vunpack.c.l.bf16 %v281_v8  ;;  %v303_v28 = vunpack.c.h.bf16 %v281_v8  ;;  %v317_v29 = vadd.f32 %v314_v25, %v313_v24 }
 0x14e   :  { %v305_v30 = vadd.f32 %v304_v26, %v302_v27  ;;  %v315_v31 = vmul.f32 %v302_v27, %v302_v27  ;;  %v316_v33 = vmul.f32 %v303_v28, %v303_v28 }
 0x150   :  { %v306_v32 = vadd.f32 %v305_v30, %v303_v28  ;;  %v318_v34 = vadd.f32 %v317_v29, %v315_v31 }
 0x152   :  { %v307_v35 = vrot.slane %v306_v32, 4  ;;  %v319_v36 = vadd.f32 %v318_v34, %v316_v33 }
 0x154   :  { %v308_v37 = vadd.f32 %v307_v35, %v306_v32  ;;  %v320_v38 = vrot.slane %v319_v36, 4 }
 0x156   :  { %v309_v39 = vrot.slane %v308_v37, 2  ;;  %v321_v40 = vadd.f32 %v320_v38, %v319_v36 }
 0x158   :  { %v310_v41 = vadd.f32 %v309_v39, %v308_v37  ;;  %v322_v42 = vrot.slane %v321_v40, 2 }
 0x15a   :  { %v311_v43 = vrot.slane %v310_v41, 1  ;;  %v323_v44 = vadd.f32 %v322_v42, %v321_v40 }
 0x15c   :  { %v324_v45 = vrot.slane %v323_v44, 1  ;;  %v312_v46 = vadd.f32 %v311_v43, %v310_v41 }
 0x15e   :  { %v325_v47 = vadd.f32 %v324_v45, %v323_v44 }
 0x160   :  { %v327_v48 = vsel %vm326_vm7, %v312_v46, %v325_v47 }
 0x161   :  { %328 = vst [vmem:[%s590_s3] sm:$0x3] %v327_v48 }

</bundles_post_ra>
